<compile_context>
chip_gen: v7x
topology: tpu7x:2x2x1
jax: 0.10.0
libtpu: 0.0.40
codegen_flags: <defaults>
</compile_context>

<pallas_src>
import math

import jax
import jax.numpy as jnp
from jax.experimental import pallas as pl
from jax.experimental.pallas import tpu as pltpu

LANES = 128     # vreg lane width; batch maps onto the lane axis
HIDDEN = 10     # width of the single nonlinear layer after collapsing
N_PARAMS = 2 * HIDDEN + 2   # t[0:10], e[10:20], A[20], B[21]


def _round_up(a, m):
    return ((a + m - 1) // m) * m


# -----------------------------------------------------------------------------
# Kernel: y = A*x + B + sum_j e_j * |x + t_j|
#   p_ref : SMEM f32[22] -> [0:10]=t, [10:20]=e, [20]=A, [21]=B
#   x_ref : VMEM (TR, 128) lane-dense batch slab
#   o_ref : VMEM (TR, 128) lane-dense output slab
# -----------------------------------------------------------------------------
def net0_kernel(p_ref, x_ref, o_ref):
    x = x_ref[...]                                          # (TR, 128) f32
    acc = x * p_ref[2 * HIDDEN] + p_ref[2 * HIDDEN + 1]     # A*x + B
    for j in range(HIDDEN):                                 # unrolled VPU chain
        acc = acc + jnp.abs(x + p_ref[j]) * p_ref[HIDDEN + j]
    o_ref[...] = acc.astype(o_ref.dtype)


def collapse_params(params):
    """Fold the 3 pre-ReLU Linears and the 2 post-ReLU Linears into one affine
    map each, then apply the relu(z)=0.5*(z+|z|) reformulation:
        y = A*x + B + sum_j e_j*|x + t_j|
    Units with w_pre[j] == 0 contribute the constant relu(b_pre[j]) which is
    folded into B (their e_j, t_j are zeroed). Returns a packed f32[22] array
    destined for SMEM."""
    w1, b1 = params["f1_w"], params["f1_b"]      # (1,5),  (1,5)
    w2, b2 = params["f2_w"], params["f2_b"]      # (5,10), (1,10)
    w3, b3 = params["f3_w"], params["f3_b"]      # (10,10),(1,10)
    w4, b4 = params["fc1_w"], params["fc1_b"]    # (10,5), (1,5)
    w5, b5 = params["fc2_w"], params["fc2_b"]    # (5,1),  (1,1)

    w_pre = ((w1 @ w2) @ w3).reshape(-1)                     # (10,)
    b_pre = ((b1 @ w2 + b2) @ w3 + b3).reshape(-1)           # (10,)
    w_post = (w4 @ w5).reshape(-1)                           # (10,)
    b_post = (b4 @ w5 + b5).reshape(-1)                      # (1,)

    nz = w_pre != 0.0
    safe_w = jnp.where(nz, w_pre, 1.0)
    t = jnp.where(nz, b_pre / safe_w, 0.0)
    e = jnp.where(nz, 0.5 * w_post * jnp.abs(w_pre), 0.0)
    A = jnp.sum(jnp.where(nz, 0.5 * w_post * w_pre, 0.0))
    B = (b_post[0]
         + jnp.sum(jnp.where(nz, 0.5 * w_post * b_pre, 0.0))
         + jnp.sum(jnp.where(nz, 0.0, w_post * jnp.maximum(b_pre, 0.0))))

    packed = jnp.concatenate([t, e, jnp.stack([A, B])]).astype(jnp.float32)
    return packed                                            # f32[22]


def net0_forward(x, params, *, block_rows=1024):
    """x: (N, 1) float32. Returns (N, 1) float32 — same semantics as Net0.forward."""
    n = x.shape[0]
    if n == 0:
        return jnp.zeros((0, 1), jnp.float32)

    packed = collapse_params(params)
    block_rows = max(8, _round_up(block_rows, 8))            # (8,128)-safe tile

    # Lane-dense layout: flat batch -> (rows, 128). Pad only to the next
    # multiple of 128, and only when needed (lane-aligned N is a free reshape).
    n_pad = _round_up(n, LANES)
    rows = n_pad // LANES
    x_flat = x.reshape(-1).astype(jnp.float32)
    if n_pad != n:
        x_flat = jnp.pad(x_flat, (0, n_pad - n))
    x2d = x_flat.reshape(rows, LANES)

    if rows <= 8:
        tr = rows            # single block == full array (tiny batches)
    else:
        # Cap the tile so the grid has >=4 blocks when possible (keeps both
        # v7x TensorCores busy); 512-1024-row tiles already amortize the
        # per-step pipeline overhead, bigger buys nothing.
        tr = min(block_rows, _round_up(pl.cdiv(rows, 4), 8))
    grid = pl.cdiv(rows, tr)   # partial last block handled by Pallas masking

    out2d = pl.pallas_call(
        net0_kernel,
        out_shape=jax.ShapeDtypeStruct((rows, LANES), jnp.float32),
        grid_spec=pltpu.PrefetchScalarGridSpec(
            num_scalar_prefetch=0,
            grid=(grid,),
            in_specs=[
                # 22 collapsed parameter scalars, resident in SMEM.
                pl.BlockSpec(memory_space=pltpu.MemorySpace.SMEM),
                # Streaming lane-dense batch slab.
                pl.BlockSpec((tr, LANES), lambda i: (i, 0)),
            ],
            out_specs=pl.BlockSpec((tr, LANES), lambda i: (i, 0)),
        ),
        compiler_params=pltpu.CompilerParams(
            dimension_semantics=("parallel",)),
    )(packed, x2d)

    flat = out2d.reshape(-1)
    if flat.shape[0] != n:                                   # only when padded
        flat = flat[:n]
    return flat.reshape(n, 1)


def init_params(key):
    """Deterministic init mirroring PyTorch nn.Linear default (U(-k, k), k=1/sqrt(fan_in)).
    Weights stored as (in, out); biases as (1, out)."""
    dims = [("f1", 1, 5), ("f2", 5, 10), ("f3", 10, 10), ("fc1", 10, 5), ("fc2", 5, 1)]
    params = {}
    for name, fan_in, fan_out in dims:
        key, kw, kb = jax.random.split(key, 3)
        bound = 1.0 / math.sqrt(fan_in)
        params[name + "_w"] = jax.random.uniform(
            kw, (fan_in, fan_out), jnp.float32, minval=-bound, maxval=bound)
        params[name + "_b"] = jax.random.uniform(
            kb, (1, fan_out), jnp.float32, minval=-bound, maxval=bound)
    return params


def net0_reference(x, params):
    """Un-collapsed reference: exactly the original 5-layer chain."""
    h = x @ params["f1_w"] + params["f1_b"]
    h = h @ params["f2_w"] + params["f2_b"]
    h = jnp.maximum(h @ params["f3_w"] + params["f3_b"], 0.0)
    h = h @ params["fc1_w"] + params["fc1_b"]
    h = h @ params["fc2_w"] + params["fc2_b"]
    return h


if __name__ == "__main__":
    key = jax.random.PRNGKey(0)
    key, kp = jax.random.split(key)
    params = init_params(kp)

    # Small batches covering: tiny (N=2), lane-aligned zero-copy (N=512),
    # padded (N=1000), and multi-block with a partial boundary block (N=2500).
    for n in (2, 512, 1000, 2500):
        key, kx = jax.random.split(key)
        x = jax.random.normal(kx, (n, 1), jnp.float32)

        out = jax.block_until_ready(net0_forward(x, params))
        ref = net0_reference(x, params)

        assert out.shape == (n, 1)
        # Tiny fp differences from the wrapper-side layer collapse + |x| rewrite.
        assert jnp.allclose(out, ref, atol=1e-4, rtol=1e-4), f"mismatch vs JAX reference at N={n}"

    print("KERNEL_OK")
</pallas_src>

<mosaic_0001>
module attributes {stable_mosaic.version = 11 : i64} {
  func.func @net0_kernel(%arg0: i32, %arg1: memref<22xf32, #tpu.memory_space<smem>>, %arg2: memref<1x128xf32, #tpu.memory_space<vmem>>, %arg3: memref<1x128xf32, #tpu.memory_space<vmem>>) attributes {dimension_semantics = [#tpu.dimension_semantics<parallel>], iteration_bounds = array<i64: 1>, scalar_prefetch = 0 : i64, scratch_operands = 0 : i64, tpu.core_type = #tpu.core_type<tc>, window_params = [{transform_indices = @transform_0, window_bounds = array<i64: 22>}, {transform_indices = @transform_1, window_bounds = array<i64: 1, 128>}, {transform_indices = @transform_2, window_bounds = array<i64: 1, 128>}]} {
    %c0 = arith.constant 0 : index
    %c0_0 = arith.constant 0 : index
    %0 = vector.load %arg2[%c0, %c0_0] : memref<1x128xf32, #tpu.memory_space<vmem>>, vector<1x128xf32>
    %c20 = arith.constant 20 : index
    %1 = memref.load %arg1[%c20] : memref<22xf32, #tpu.memory_space<smem>>
    %2 = vector.broadcast %1 : f32 to vector<1x128xf32>
    %3 = arith.mulf %0, %2 : vector<1x128xf32>
    %c21 = arith.constant 21 : index
    %4 = memref.load %arg1[%c21] : memref<22xf32, #tpu.memory_space<smem>>
    %5 = vector.broadcast %4 : f32 to vector<1x128xf32>
    %6 = arith.addf %3, %5 : vector<1x128xf32>
    %c0_1 = arith.constant 0 : index
    %7 = memref.load %arg1[%c0_1] : memref<22xf32, #tpu.memory_space<smem>>
    %8 = vector.broadcast %7 : f32 to vector<1x128xf32>
    %9 = arith.addf %0, %8 : vector<1x128xf32>
    %10 = math.absf %9 : vector<1x128xf32>
    %c10 = arith.constant 10 : index
    %11 = memref.load %arg1[%c10] : memref<22xf32, #tpu.memory_space<smem>>
    %12 = vector.broadcast %11 : f32 to vector<1x128xf32>
    %13 = arith.mulf %10, %12 : vector<1x128xf32>
    %14 = arith.addf %6, %13 : vector<1x128xf32>
    %c1 = arith.constant 1 : index
    %15 = memref.load %arg1[%c1] : memref<22xf32, #tpu.memory_space<smem>>
    %16 = vector.broadcast %15 : f32 to vector<1x128xf32>
    %17 = arith.addf %0, %16 : vector<1x128xf32>
    %18 = math.absf %17 : vector<1x128xf32>
    %c11 = arith.constant 11 : index
    %19 = memref.load %arg1[%c11] : memref<22xf32, #tpu.memory_space<smem>>
    %20 = vector.broadcast %19 : f32 to vector<1x128xf32>
    %21 = arith.mulf %18, %20 : vector<1x128xf32>
    %22 = arith.addf %14, %21 : vector<1x128xf32>
    %c2 = arith.constant 2 : index
    %23 = memref.load %arg1[%c2] : memref<22xf32, #tpu.memory_space<smem>>
    %24 = vector.broadcast %23 : f32 to vector<1x128xf32>
    %25 = arith.addf %0, %24 : vector<1x128xf32>
    %26 = math.absf %25 : vector<1x128xf32>
    %c12 = arith.constant 12 : index
    %27 = memref.load %arg1[%c12] : memref<22xf32, #tpu.memory_space<smem>>
    %28 = vector.broadcast %27 : f32 to vector<1x128xf32>
    %29 = arith.mulf %26, %28 : vector<1x128xf32>
    %30 = arith.addf %22, %29 : vector<1x128xf32>
    %c3 = arith.constant 3 : index
    %31 = memref.load %arg1[%c3] : memref<22xf32, #tpu.memory_space<smem>>
    %32 = vector.broadcast %31 : f32 to vector<1x128xf32>
    %33 = arith.addf %0, %32 : vector<1x128xf32>
    %34 = math.absf %33 : vector<1x128xf32>
    %c13 = arith.constant 13 : index
    %35 = memref.load %arg1[%c13] : memref<22xf32, #tpu.memory_space<smem>>
    %36 = vector.broadcast %35 : f32 to vector<1x128xf32>
    %37 = arith.mulf %34, %36 : vector<1x128xf32>
    %38 = arith.addf %30, %37 : vector<1x128xf32>
    %c4 = arith.constant 4 : index
    %39 = memref.load %arg1[%c4] : memref<22xf32, #tpu.memory_space<smem>>
    %40 = vector.broadcast %39 : f32 to vector<1x128xf32>
    %41 = arith.addf %0, %40 : vector<1x128xf32>
    %42 = math.absf %41 : vector<1x128xf32>
    %c14 = arith.constant 14 : index
    %43 = memref.load %arg1[%c14] : memref<22xf32, #tpu.memory_space<smem>>
    %44 = vector.broadcast %43 : f32 to vector<1x128xf32>
    %45 = arith.mulf %42, %44 : vector<1x128xf32>
    %46 = arith.addf %38, %45 : vector<1x128xf32>
    %c5 = arith.constant 5 : index
    %47 = memref.load %arg1[%c5] : memref<22xf32, #tpu.memory_space<smem>>
    %48 = vector.broadcast %47 : f32 to vector<1x128xf32>
    %49 = arith.addf %0, %48 : vector<1x128xf32>
    %50 = math.absf %49 : vector<1x128xf32>
    %c15 = arith.constant 15 : index
    %51 = memref.load %arg1[%c15] : memref<22xf32, #tpu.memory_space<smem>>
    %52 = vector.broadcast %51 : f32 to vector<1x128xf32>
    %53 = arith.mulf %50, %52 : vector<1x128xf32>
    %54 = arith.addf %46, %53 : vector<1x128xf32>
    %c6 = arith.constant 6 : index
    %55 = memref.load %arg1[%c6] : memref<22xf32, #tpu.memory_space<smem>>
    %56 = vector.broadcast %55 : f32 to vector<1x128xf32>
    %57 = arith.addf %0, %56 : vector<1x128xf32>
    %58 = math.absf %57 : vector<1x128xf32>
    %c16 = arith.constant 16 : index
    %59 = memref.load %arg1[%c16] : memref<22xf32, #tpu.memory_space<smem>>
    %60 = vector.broadcast %59 : f32 to vector<1x128xf32>
    %61 = arith.mulf %58, %60 : vector<1x128xf32>
    %62 = arith.addf %54, %61 : vector<1x128xf32>
    %c7 = arith.constant 7 : index
    %63 = memref.load %arg1[%c7] : memref<22xf32, #tpu.memory_space<smem>>
    %64 = vector.broadcast %63 : f32 to vector<1x128xf32>
    %65 = arith.addf %0, %64 : vector<1x128xf32>
    %66 = math.absf %65 : vector<1x128xf32>
    %c17 = arith.constant 17 : index
    %67 = memref.load %arg1[%c17] : memref<22xf32, #tpu.memory_space<smem>>
    %68 = vector.broadcast %67 : f32 to vector<1x128xf32>
    %69 = arith.mulf %66, %68 : vector<1x128xf32>
    %70 = arith.addf %62, %69 : vector<1x128xf32>
    %c8 = arith.constant 8 : index
    %71 = memref.load %arg1[%c8] : memref<22xf32, #tpu.memory_space<smem>>
    %72 = vector.broadcast %71 : f32 to vector<1x128xf32>
    %73 = arith.addf %0, %72 : vector<1x128xf32>
    %74 = math.absf %73 : vector<1x128xf32>
    %c18 = arith.constant 18 : index
    %75 = memref.load %arg1[%c18] : memref<22xf32, #tpu.memory_space<smem>>
    %76 = vector.broadcast %75 : f32 to vector<1x128xf32>
    %77 = arith.mulf %74, %76 : vector<1x128xf32>
    %78 = arith.addf %70, %77 : vector<1x128xf32>
    %c9 = arith.constant 9 : index
    %79 = memref.load %arg1[%c9] : memref<22xf32, #tpu.memory_space<smem>>
    %80 = vector.broadcast %79 : f32 to vector<1x128xf32>
    %81 = arith.addf %0, %80 : vector<1x128xf32>
    %82 = math.absf %81 : vector<1x128xf32>
    %c19 = arith.constant 19 : index
    %83 = memref.load %arg1[%c19] : memref<22xf32, #tpu.memory_space<smem>>
    %84 = vector.broadcast %83 : f32 to vector<1x128xf32>
    %85 = arith.mulf %82, %84 : vector<1x128xf32>
    %86 = arith.addf %78, %85 : vector<1x128xf32>
    %c0_2 = arith.constant 0 : index
    %c0_3 = arith.constant 0 : index
    %87 = vector.load %arg3[%c0_2, %c0_3] : memref<1x128xf32, #tpu.memory_space<vmem>>, vector<1x128xf32>
    tpu.vector_store %arg3[%c0_2, %c0_3], %86 {strides = array<i32>} : memref<1x128xf32, #tpu.memory_space<vmem>>, vector<1x128xf32>,
    return
  }
  func.func @transform_0(%arg0: i32) -> i32 {
    %c0_i32 = arith.constant 0 : i32
    %c0_i32_0 = arith.constant 0 : i32
    return %c0_i32 : i32
  }
  func.func @transform_1(%arg0: i32) -> (i32, i32) {
    %c0_i32 = arith.constant 0 : i32
    %c0_i32_0 = arith.constant 0 : i32
    return %arg0, %c0_i32 : i32, i32
  }
  func.func @transform_2(%arg0: i32) -> (i32, i32) {
    %c0_i32 = arith.constant 0 : i32
    %c0_i32_0 = arith.constant 0 : i32
    return %arg0, %c0_i32 : i32, i32
  }
}

</mosaic_0001>

<bundles_post_ra>
// kernel: tpu_custom_call.1
= control target key start
LH: loop header
LB: loop body
LE: loop exit
PB: predicated region body
PF: predicated region fallthrough
CT: control target
= control target key end

     0   :  { %7 = vsyncpa [#allocation4], 0  ;;  %s268_s0 = inlined_call_operand.hbm [shape: f32[22], index: 0, kind: input, shape index: {}]   ;;  %s269_s1 = inlined_call_operand.vmem [shape: f32[1,128], index: 1, kind: input, shape index: {}]   ;;  %s270_s2 = inlined_call_operand.hbm [shape: f32[1,128], index: 2, kind: output, shape index: {}]  }
   0x1   :  { %8 = vsyncpa [#allocation3], 0  ;;  %s149_s11 = scalar_lea.hbm %s268_s0, 16 }
   0x2   :  { %p150_p0 = scmp.ne.s32.totalorder %s268_s0, %s149_s11  ;;  %p153_p1 = scmp.lt.u32.totalorder %s149_s11, %s268_s0 }
   0x4   :  { %p155_p2 = pnand %p153_p1, %p150_p0 }
   0x6   :  { %158 = shalt.err (!%p155_p2)
}
   0x7   :  { %s185_s16 = smov [#allocation2]  }
   0x8   :  { %16 = dma.hbm_to_smem %s268_s0, 16, %s185_s16, [#allocation4]  }
   0x9   :  { %181 = dma.done.wait [#allocation4], 16  }
   0xa   :  { %182 = vsyncadd [#allocation4], 4294967280 }
   0xb   :  { %22 = sfence }
   0xc   :  { %s126_s19 = sld [smem:[#allocation2 + $0x14]]  ;;  %s127_s20 = sld [smem:[#allocation2 + $0x15]]  ;;  %v23_v0 = vld [vmem:[%s269_s1] sm:$0x1] }
   0xd   :  { %s30_s21 = sld [smem:[#allocation2]]  ;;  %s214_s22 = sld [smem:[#allocation2 + $0xa]] }
   0xe   :  { %s129_s23 = sld [smem:[#allocation2 + $0x1]]  ;;  %s216_s24 = sld [smem:[#allocation2 + $0xb]] }
   0xf   :  { %s131_s25 = sld [smem:[#allocation2 + $0x2]]  ;;  %s218_s26 = sld [smem:[#allocation2 + $0xc]] }
  0x10   :  { %s133_s27 = sld [smem:[#allocation2 + $0x3]]  ;;  %s220_s28 = sld [smem:[#allocation2 + $0xd]] }
  0x11   :  { %s135_s30 = sld [smem:[#allocation2 + $0x4]]  ;;  %s225_s3 = sld [smem:[#allocation2 + $0xe]] }
  0x12   :  { %v25_v1 = vstv %s126_s19  ;;  %v28_v2 = vstv %s127_s20  ;;  %s227_s4 = sld [smem:[#allocation2 + $0x5]]  ;;  %s229_s5 = sld [smem:[#allocation2 + $0x6]] }
  0x13   :  { %v26_v3 = vmul.f32 %v25_v1, %v23_v0  ;;  %v31_v4 = vstv %s30_s21  ;;  %v35_v6 = vstv %s214_s22  ;;  %s232_s6 = sld [smem:[#allocation2 + $0x7]]  ;;  %s237_s7 = sld [smem:[#allocation2 + $0x8]] }
  0x14   :  { %v32_v5 = vadd.f32 %v31_v4, %v23_v0  ;;  %v39_v7 = vstv %s129_s23  ;;  %v43_v10 = vstv %s216_s24  ;;  %s235_s1 = sld [smem:[#allocation2 + $0xf]]  ;;  %s240_s8 = sld [smem:[#allocation2 + $0x9]] }
  0x15   :  { %v29_v8 = vadd.f32 %v28_v2, %v26_v3  ;;  %v40_v9 = vadd.f32 %v39_v7, %v23_v0  ;;  %v47_v11 = vstv %s131_s25  ;;  %v51_v14 = vstv %s218_s26  ;;  %s243_s9 = sld [smem:[#allocation2 + $0x10]]  ;;  %s247_s10 = sld [smem:[#allocation2 + $0x11]] }
  0x16   :  { %v33_v12 = vand.u32 2147483647, %v32_v5  ;;  %v48_v13 = vadd.f32 %v47_v11, %v23_v0  ;;  %v55_v15 = vstv %s133_s27  ;;  %v59_v18 = vstv %s220_s28  ;;  %s144_s11 = sld [smem:[#allocation2 + $0x12]]  ;;  %s146_s12 = sld [smem:[#allocation2 + $0x13]] }
  0x17   :  { %v41_v16 = vand.u32 2147483647, %v40_v9  ;;  %v56_v17 = vadd.f32 %v55_v15, %v23_v0  ;;  %v63_v19 = vstv %s135_s30  ;;  %v67_v26 = vstv %s225_s3  ;;  %s186_s13 = smov [#allocation5]  }
  0x18   :  { %v36_v20 = vmul.f32 %v35_v6, %v33_v12  ;;  %v49_v21 = vand.u32 2147483647, %v48_v13  ;;  %v64_v22 = vadd.f32 %v63_v19, %v23_v0  ;;  %v71_v23 = vstv %s227_s4  ;;  %s117_s14 = sshll.u32 %s186_s13, 4  ;;  %s118_s14 = int_to_ptr.vmem [resolvable:$true] %s117_s14 }
  0x19   :  { %v44_v24 = vmul.f32 %v43_v10, %v41_v16  ;;  %v57_v25 = vand.u32 2147483647, %v56_v17  ;;  %v72_v27 = vadd.f32 %v71_v23, %v23_v0  ;;  %v79_v31 = vstv %s229_s5  ;;  %s159_s15 = scalar_lea.vmem %s118_s14, 16  ;;  %s163_s16 = scalar_lea.vmem %s118_s14, 32 }
  0x1a   :  { %v37_v28 = vadd.f32 %v36_v20, %v29_v8  ;;  %v52_v29 = vmul.f32 %v51_v14, %v49_v21  ;;  %v65_v30 = vand.u32 2147483647, %v64_v22  ;;  %v80_v32 = vadd.f32 %v79_v31, %v23_v0  ;;  %p160_p3 = scmp.ne.s32.totalorder %s118_s14, %s159_s15  ;;  %p164_p4 = scmp.lt.s32.totalorder %s118_s14, %s118_s14 }
  0x1b   :  { %v60_v34 = vmul.f32 %v59_v18, %v57_v25  ;;  %v73_v35 = vand.u32 2147483647, %v72_v27  ;;  %v87_v36 = vstv %s232_s6  ;;  %v75_v38 = vstv %s235_s1  ;;  %p165_p5 = scmp.lt.s32.totalorder %s163_s16, %s159_s15 }
  0x1c   :  { %v45_v33 = vadd.f32 %v44_v24, %v37_v28  ;;  %v68_v37 = vmul.f32 %v67_v26, %v65_v30  ;;  %v88_v39 = vadd.f32 %v87_v36, %v23_v0  ;;  %v95_v40 = vstv %s237_s7 }
  0x1d   :  { %v81_v42 = vand.u32 2147483647, %v80_v32  ;;  %v96_v43 = vadd.f32 %v95_v40, %v23_v0  ;;  %v103_v44 = vstv %s240_s8  ;;  %v83_v45 = vstv %s243_s9  ;;  %p166_p6 = por %p165_p5, %p164_p4 }
  0x1e   :  { %v53_v41 = vadd.f32 %v52_v29, %v45_v33  ;;  %v76_v47 = vmul.f32 %v75_v38, %v73_v35  ;;  %v89_v48 = vand.u32 2147483647, %v88_v39  ;;  %v104_v49 = vadd.f32 %v103_v44, %v23_v0 }
  0x1f   :  { %v91_v50 = vstv %s247_s10  ;;  %v84_v52 = vmul.f32 %v83_v45, %v81_v42  ;;  %v97_v53 = vand.u32 2147483647, %v96_v43  ;;  %v99_v54 = vstv %s144_s11  ;;  %p167_p7 = pnand %p166_p6, %p160_p3 }
  0x20   :  { %v61_v46 = vadd.f32 %v60_v34, %v53_v41  ;;  %v92_v56 = vmul.f32 %v91_v50, %v89_v48  ;;  %v105_v57 = vand.u32 2147483647, %v104_v49  ;;  %v107_v58 = vstv %s146_s12 }
  0x21   :  { %v100_v60 = vmul.f32 %v99_v54, %v97_v53 }
  0x22   :  { %v69_v51 = vadd.f32 %v68_v37, %v61_v46  ;;  %v108_v62 = vmul.f32 %v107_v58, %v105_v57 }
  0x24   :  { %v77_v55 = vadd.f32 %v76_v47, %v69_v51 }
  0x26   :  { %v85_v59 = vadd.f32 %v84_v52, %v77_v55 }
  0x28   :  { %v93_v61 = vadd.f32 %v92_v56, %v85_v59 }
  0x2a   :  { %v101_v63 = vadd.f32 %v100_v60, %v93_v61 }
  0x2c   :  { %v109_v1 = vadd.f32 %v108_v62, %v101_v63 }
  0x2e   :  { %110 = vst [vmem:[#allocation5] sm:$0x1] %v109_v1 }
  0x2f   :  { %170 = shalt.err (!%p167_p7)
}
  0x30   :  { %s171_s19 = scalar_lea.hbm %s270_s2, 16 }
  0x31   :  { %p172_p8 = scmp.ne.s32.totalorder %s270_s2, %s171_s19  ;;  %p175_p9 = scmp.lt.u32.totalorder %s171_s19, %s270_s2 }
  0x33   :  { %p177_p10 = pnand %p175_p9, %p172_p8 }
  0x35   :  { %180 = shalt.err (!%p177_p10)
}
  0x36   :  { %120 = dma.vmem_to_hbm [thread:$0]  %s118_s14, 16, %s270_s2, [#allocation3]  }
  0x37   :  { %183 = dma.done.wait [#allocation3], 16  }
  0x38   :  { %184 = vsyncadd [#allocation3], 4294967280 }
  0x39   :  { %124 = vsyncpa [#allocation3], 1 }
  0x3a   :  { %125 = vsyncpa [#allocation4], 1 }

</bundles_post_ra>
